<compile_context>
chip_gen: v7x
topology: tpu7x:2x2x1
jax: 0.10.0
libtpu: 0.0.40
codegen_flags: <defaults>
</compile_context>

<pallas_src>
import functools

import jax
import jax.numpy as jnp
from jax import lax
from jax.experimental import pallas as pl
from jax.experimental.pallas import tpu as pltpu


def _rmsnorm_kernel(x_ref, w_ref, o_ref, *, eps: float, inv_dim: float):
    # Upcast to float32 (matches x.float() in the reference).
    x = x_ref[...].astype(jnp.float32)
    # (1 + weight), computed once per grid step, broadcasts over rows.
    w1 = 1.0 + w_ref[...].astype(jnp.float32)            # (1, D)
    # mean of squares over the last (lane) axis; divide folded into inv_dim.
    mean_sq = jnp.sum(x * x, axis=-1, keepdims=True) * inv_dim
    # Fused normalize + scale, cast back to the input dtype.
    o_ref[...] = (x * lax.rsqrt(mean_sq + eps) * w1).astype(o_ref.dtype)


def _vmem_capacity_bytes() -> int:
    """Per-TensorCore VMEM capacity; falls back to the smallest (v7x) value."""
    try:
        cap = getattr(pltpu.get_tpu_info(), "vmem_capacity_bytes", None)
        if cap:
            return int(cap)
    except Exception:
        pass
    return 64 * 1024 * 1024  # conservative: v7x per-TC VMEM


def _pick_row_tile(rows: int, dim: int, itemsize: int,
                   max_row_tile: int | None) -> tuple[int, int]:
    """Largest sublane-aligned row tile that fits the double-buffered budget."""
    vmem_cap = _vmem_capacity_bytes()
    budget = vmem_cap // 2  # headroom for compiler scratch / f32 intermediates
    # Per-row VMEM cost: double-buffered input + output tiles in the native
    # dtype (4 copies) plus ~4 tile-widths of f32 working set inside the body.
    per_row = dim * (4 * itemsize + 4 * 4)
    sublane = 8 * max(1, 4 // itemsize)       # f32: 8, bf16: 16, 8-bit: 32
    target = budget // max(per_row, 1)
    target = max(sublane, min(target, 1024))
    if max_row_tile is not None:
        target = max(sublane, min(target, max_row_tile))
    target = (target // sublane) * sublane

    if rows <= target:
        row_tile = rows          # single block; "full array dim" is always legal
    else:
        row_tile = target        # cdiv grid + masked partial last tile

    # VMEM limit: double-buffered in/out + f32 working set, +25% headroom.
    need = row_tile * dim * (4 * itemsize + 4 * 4) + 2 * dim * 4
    vmem_limit = min(vmem_cap, max(int(need * 1.25), 16 * 1024 * 1024))
    return row_tile, vmem_limit


def gemma_rmsnorm(x: jax.Array, weight: jax.Array, eps: float = 1e-6,
                  max_row_tile: int | None = None) -> jax.Array:
    """RMSNorm over the last axis of x (any leading dims), Gemma style."""
    orig_shape = x.shape
    dim = orig_shape[-1]
    assert weight.shape == (dim,)

    x2d = x.reshape(-1, dim)
    rows = x2d.shape[0]
    w2d = weight.reshape(1, dim)

    row_tile, vmem_limit = _pick_row_tile(rows, dim, x.dtype.itemsize,
                                          max_row_tile)
    grid = (pl.cdiv(rows, row_tile),)

    kernel = functools.partial(_rmsnorm_kernel, eps=eps, inv_dim=1.0 / dim)

    cost = pl.CostEstimate(
        flops=4 * rows * dim,
        transcendentals=rows,
        bytes_accessed=2 * rows * dim * x.dtype.itemsize
                       + dim * weight.dtype.itemsize,
    )

    out2d = pl.pallas_call(
        kernel,
        out_shape=jax.ShapeDtypeStruct((rows, dim), x.dtype),
        grid_spec=pltpu.PrefetchScalarGridSpec(
            num_scalar_prefetch=0,
            grid=grid,
            in_specs=[
                pl.BlockSpec((row_tile, dim), lambda i: (i, 0)),
                pl.BlockSpec((1, dim), lambda i: (0, 0)),
            ],
            out_specs=pl.BlockSpec((row_tile, dim), lambda i: (i, 0)),
        ),
        compiler_params=pltpu.CompilerParams(
            dimension_semantics=("parallel",),
            vmem_limit_bytes=int(vmem_limit)),
        cost_estimate=cost,
    )(x2d, w2d)

    return out2d.reshape(orig_shape)


def gemma_rmsnorm_ref(x, weight, eps=1e-6):
    xf = x.astype(jnp.float32)
    ms = jnp.mean(xf * xf, axis=-1, keepdims=True)
    out = xf * lax.rsqrt(ms + eps) * (1.0 + weight.astype(jnp.float32))
    return out.astype(x.dtype)


if __name__ == "__main__":
    key = jax.random.PRNGKey(0)
    kx, kw, kx2, kw2 = jax.random.split(key, 4)

    # Case 1: small f32 case matching the module's (batch, seq, dim) layout.
    batch, seq, dim = 2, 8, 32
    x = jax.random.normal(kx, (batch, seq, dim), dtype=jnp.float32)
    # nn.Parameter(torch.zeros(dim)) -> zero init; perturb deterministically so
    # the (1 + weight) scaling path is actually exercised.
    weight = jnp.zeros((dim,), dtype=jnp.float32) + 0.1 * jax.random.normal(
        kw, (dim,), dtype=jnp.float32)

    out = jax.block_until_ready(gemma_rmsnorm(x, weight, eps=1e-6))
    ref = gemma_rmsnorm_ref(x, weight, eps=1e-6)
    assert out.shape == x.shape and out.dtype == x.dtype
    assert jnp.allclose(out, ref, atol=1e-5, rtol=1e-5)

    # Case 2: bf16, lane-aligned dim, row count NOT divisible by the tile
    # (exercises the cdiv grid + masked partial last tile path).
    b2, s2, d2 = 3, 37, 256
    x2 = jax.random.normal(kx2, (b2, s2, d2), dtype=jnp.float32).astype(
        jnp.bfloat16)
    w2 = 0.1 * jax.random.normal(kw2, (d2,), dtype=jnp.float32)

    out2 = jax.block_until_ready(gemma_rmsnorm(x2, w2, eps=1e-6,
                                               max_row_tile=32))
    ref2 = gemma_rmsnorm_ref(x2, w2, eps=1e-6)
    assert out2.shape == x2.shape and out2.dtype == x2.dtype
    assert jnp.allclose(out2.astype(jnp.float32), ref2.astype(jnp.float32),
                        atol=2e-2, rtol=2e-2)

    print("KERNEL_OK")
</pallas_src>

<mosaic_0001>
module attributes {stable_mosaic.version = 11 : i64} {
  func.func @_rmsnorm_kernel(%arg0: i32, %arg1: memref<16x32xf32, #tpu.memory_space<vmem>>, %arg2: memref<1x32xf32, #tpu.memory_space<vmem>>, %arg3: memref<16x32xf32, #tpu.memory_space<vmem>>) attributes {dimension_semantics = [#tpu.dimension_semantics<parallel>], iteration_bounds = array<i64: 1>, scalar_prefetch = 0 : i64, scratch_operands = 0 : i64, tpu.core_type = #tpu.core_type<tc>, window_params = [{transform_indices = @transform_0, window_bounds = array<i64: 16, 32>}, {pipeline_mode = #tpu.pipeline_mode<synchronous>, transform_indices = @transform_1, window_bounds = array<i64: 1, 32>}, {transform_indices = @transform_2, window_bounds = array<i64: 16, 32>}]} {
    %c0 = arith.constant 0 : index
    %c0_0 = arith.constant 0 : index
    %0 = vector.load %arg1[%c0, %c0_0] : memref<16x32xf32, #tpu.memory_space<vmem>>, vector<16x32xf32>
    %c0_1 = arith.constant 0 : index
    %c0_2 = arith.constant 0 : index
    %1 = vector.load %arg2[%c0_1, %c0_2] : memref<1x32xf32, #tpu.memory_space<vmem>>, vector<1x32xf32>
    %cst = arith.constant 1.000000e+00 : f32
    %2 = vector.broadcast %cst : f32 to vector<1x32xf32>
    %3 = arith.addf %2, %1 : vector<1x32xf32>
    %4 = arith.mulf %0, %0 : vector<16x32xf32>
    %cst_3 = arith.constant dense<0.000000e+00> : vector<16xf32>
    %5 = vector.multi_reduction <add>, %4, %cst_3 [1] : vector<16x32xf32> to vector<16xf32>
    %6 = vector.shape_cast %5 : vector<16xf32> to vector<16x1xf32>
    %cst_4 = arith.constant 3.125000e-02 : f32
    %7 = vector.broadcast %cst_4 : f32 to vector<16x1xf32>
    %8 = arith.mulf %6, %7 : vector<16x1xf32>
    %cst_5 = arith.constant 9.99999997E-7 : f32
    %9 = vector.broadcast %cst_5 : f32 to vector<16x1xf32>
    %10 = arith.addf %8, %9 : vector<16x1xf32>
    %11 = math.rsqrt %10 : vector<16x1xf32>
    %12 = vector.broadcast %11 : vector<16x1xf32> to vector<16x32xf32>
    %13 = arith.mulf %0, %12 : vector<16x32xf32>
    %14 = vector.broadcast %3 : vector<1x32xf32> to vector<16x32xf32>
    %15 = arith.mulf %13, %14 : vector<16x32xf32>
    %c0_6 = arith.constant 0 : index
    %c0_7 = arith.constant 0 : index
    %16 = vector.load %arg3[%c0_6, %c0_7] : memref<16x32xf32, #tpu.memory_space<vmem>>, vector<16x32xf32>
    tpu.vector_store %arg3[%c0_6, %c0_7], %15 {strides = array<i32>} : memref<16x32xf32, #tpu.memory_space<vmem>>, vector<16x32xf32>,
    return
  }
  func.func @transform_0(%arg0: i32) -> (i32, i32) {
    %c0_i32 = arith.constant 0 : i32
    %c0_i32_0 = arith.constant 0 : i32
    return %arg0, %c0_i32 : i32, i32
  }
  func.func @transform_1(%arg0: i32) -> (i32, i32) {
    %c0_i32 = arith.constant 0 : i32
    %c0_i32_0 = arith.constant 0 : i32
    %c0_i32_1 = arith.constant 0 : i32
    return %c0_i32, %c0_i32_0 : i32, i32
  }
  func.func @transform_2(%arg0: i32) -> (i32, i32) {
    %c0_i32 = arith.constant 0 : i32
    %c0_i32_0 = arith.constant 0 : i32
    return %arg0, %c0_i32 : i32, i32
  }
}

</mosaic_0001>

<bundles_post_ra>
// kernel: tpu_custom_call.1
= control target key start
LH: loop header
LB: loop body
LE: loop exit
PB: predicated region body
PF: predicated region fallthrough
CT: control target
= control target key end

     0   :  { %7 = vsyncpa [#allocation3], 0  ;;  %s186_s0 = inlined_call_operand.hbm [shape: f32[16,32], index: 0, kind: input, shape index: {}]   ;;  %s187_s1 = inlined_call_operand.vmem [shape: f32[1,32], index: 1, kind: input, shape index: {}]   ;;  %s188_s2 = inlined_call_operand.hbm [shape: f32[16,32], index: 2, kind: output, shape index: {}]  }
   0x1   :  { %8 = vsyncpa [#allocation4], 0  ;;  %s130_s9 = smov [#allocation2]   ;;  %s82_s13 = scalar_lea.hbm %s186_s0, 256 }
   0x2   :  { %s14_s10 = sshll.u32 %s130_s9, 4  ;;  %p83_p0 = scmp.ne.s32.totalorder %s186_s0, %s82_s13  ;;  %s15_s10 = int_to_ptr.vmem [resolvable:$true] %s14_s10 }
   0x3   :  { %p86_p1 = scmp.lt.u32.totalorder %s82_s13, %s186_s0 }
   0x5   :  { %p88_p2 = pnand %p86_p1, %p83_p0 }
   0x7   :  { %91 = shalt.err (!%p88_p2)
}
   0x8   :  { %s92_s18 = scalar_lea.vmem %s15_s10, 256  ;;  %p97_p4 = scmp.lt.s32.totalorder %s15_s10, %s15_s10 }
   0x9   :  { %p93_p3 = scmp.ne.s32.totalorder %s15_s10, %s92_s18  ;;  %p98_p5 = scmp.lt.s32.totalorder %s92_s18, %s92_s18 }
   0xb   :  { %p99_p6 = por %p98_p5, %p97_p4 }
   0xd   :  { %p100_p7 = pnand %p99_p6, %p93_p3 }
   0xf   :  { %103 = shalt.err (!%p100_p7)
}
  0x10   :  { %s131_s19 = smov 128   ;;  %s132_s20 = smov 8  }
  0x11   :  { %20 = dma.hbm_to_vmem [thread:$0]  %s186_s0, 256, %s15_s10, [#allocation3], %s131_s19, %s131_s19, %s132_s20  }
  0x12   :  { %126 = dma.done.wait [#allocation3], 256  }
  0x13   :  { %127 = vsyncadd [#allocation3], 4294967040  ;;  %v26_v0 = vld [vmem:[#allocation2] sm:$0xff]  ;;  %vm32_vm0 = vcmask 261120   ;;  %v27_v1 = vld [vmem:[#allocation2 + $0x8] sm:$0xff]  ;;  %v48_v8 = vlaneseq  ;;  %s133_s24 = smov [#allocation5]  }
  0x14   :  { %v30_v2 = vmul.f32 %v26_v0, %v26_v0  ;;  %v31_v3 = vmul.f32 %v27_v1, %v27_v1  ;;  %v28_v14 = vld [vmem:[%s187_s1] sm:$0x1]  ;;  %s62_s25 = sshll.u32 %s133_s24, 4  ;;  %s63_s25 = int_to_ptr.vmem [resolvable:$true] %s62_s25 }
  0x15   :  { %v49_v12 = vshrl.u32 %v48_v8, 7  ;;  %v29_v15 = vadd.f32 1.0, %v28_v14  ;;  %s104_s26 = scalar_lea.vmem %s63_s25, 256  ;;  %p109_p9 = scmp.lt.s32.totalorder %s63_s25, %s63_s25 }
  0x16   :  { %v33_v4 = vsel %vm32_vm0, %v30_v2, 0.0  ;;  %v36_v5 = vsel %vm32_vm0, %v31_v3, 0.0  ;;  %p105_p8 = scmp.ne.s32.totalorder %s63_s25, %s104_s26  ;;  %p110_p10 = scmp.lt.s32.totalorder %s104_s26, %s104_s26 }
  0x17   :  { %34 = vadd.xlane.f32.xlu0 %v33_v4  ;;  %v50_v16 = vsub.s32 0, %v49_v12 }
  0x18   :  { %p111_p11 = por %p110_p10, %p109_p9 }
  0x19   :  { %v51_v17 = vrot.slane %v29_v15, %v50_v16 }
  0x1a   :  { %p112_p12 = pnand %p111_p11, %p105_p8 }
  0x1b   :  { %37 = vadd.xlane.f32.xlu0 %v36_v5 }
  0xa4   :  { %v35_v6 = vpop.xlane.xlu0 %34 }
  0xa5   :  { %v39_v7 = vmul.f32 0.03125, %v35_v6 }
  0xa7   :  { %v41_v9 = vadd.f32 1e-06, %v39_v7 }
  0xa8   :  { %v38_v10 = vpop.xlane.xlu0 %37 }
  0xa9   :  { %78 = vrsqrt.f32 %v41_v9  ;;  %v40_v11 = vmul.f32 0.03125, %v38_v10 }
  0xab   :  { %v42_v13 = vadd.f32 1e-06, %v40_v11 }
  0xad   :  { %80 = vrsqrt.f32 %v42_v13 }
  0xb3   :  { %v79_v18 = vpop.eup %78 }
  0xb4   :  { %v45_v19 = vmul.f32 %v79_v18, %v26_v0 }
  0xb6   :  { %v53_v20 = vmul.f32 %v51_v17, %v45_v19 }
  0xb7   :  { %v81_v21 = vpop.eup %80 }
  0xb8   :  { %v46_v22 = vmul.f32 %v81_v21, %v27_v1  ;;  %55 = vst.msk [vmem:[#allocation5] sm:$0xff] %vm32_vm0, %v53_v20 }
  0xba   :  { %v54_v23 = vmul.f32 %v51_v17, %v46_v22 }
  0xbc   :  { %56 = vst.msk [vmem:[#allocation5 + $0x8] sm:$0xff] %vm32_vm0, %v54_v23 }
  0xbd   :  { %115 = shalt.err (!%p112_p12)
}
  0xbe   :  { %s116_s28 = scalar_lea.hbm %s188_s2, 256 }
  0xbf   :  { %p117_p13 = scmp.ne.s32.totalorder %s188_s2, %s116_s28  ;;  %p120_p0 = scmp.lt.u32.totalorder %s116_s28, %s188_s2 }
  0xc1   :  { %p122_p1 = pnand %p120_p0, %p117_p13 }
  0xc3   :  { %125 = shalt.err (!%p122_p1)
}
  0xc4   :  { %68 = dma.vmem_to_hbm [thread:$0]  %s63_s25, 256, %s188_s2, [#allocation4], %s131_s19, %s131_s19, %s132_s20  }
  0xc5   :  { %128 = dma.done.wait [#allocation4], 256  }
  0xc6   :  { %129 = vsyncadd [#allocation4], 4294967040 }
  0xc7   :  { %72 = vsyncpa [#allocation3], 1 }
  0xc8   :  { %73 = vsyncpa [#allocation4], 1 }

</bundles_post_ra>
